<compile_context>
chip_gen: v7x
topology: tpu7x:2x2x1
jax: 0.10.0
libtpu: 0.0.40
codegen_flags: <defaults>
</compile_context>

<pallas_src>
import jax
import jax.numpy as jnp
from jax import lax
from jax.experimental import pallas as pl
from jax.experimental.pallas import tpu as pltpu


def _mlp_kernel(x_ref,
                w1_ref, b1_ref,
                w2_ref, b2_ref,
                w3_ref, b3_ref,
                w4_ref, b4_ref,
                o_ref):
    # Layer 1: contract the feature axis (K=128) of the batch-major bf16 input
    # tile against W1's in_features axis -> feature-major (256, tile_b) in f32.
    # Single full-depth MXU pass; the implicit RHS transpose rides the XLU.
    h = lax.dot_general(w1_ref[...], x_ref[...],
                        dimension_numbers=(((1,), (1,)), ((), ())),
                        preferred_element_type=jnp.float32)
    h = jnp.maximum(h + b1_ref[...], 0.0)
    # Dropout(0.3) is identity in eval mode.
    # Layer 2: (128,256) @ (256,T) + (128,1) -> ReLU
    h = jnp.dot(w2_ref[...], h.astype(w2_ref.dtype),
                preferred_element_type=jnp.float32)
    h = jnp.maximum(h + b2_ref[...], 0.0)
    # Layer 3: (64,128) @ (128,T) + (64,1) -> ReLU
    h = jnp.dot(w3_ref[...], h.astype(w3_ref.dtype),
                preferred_element_type=jnp.float32)
    h = jnp.maximum(h + b3_ref[...], 0.0)
    # Layer 4 (64 -> 1) on the VPU/XLU: broadcast by the (64,1) weight column and
    # reduce over sublanes -> lane-dense (1, tile_b) block; f32 throughout.
    y = jnp.sum(h * w4_ref[...], axis=0, keepdims=True) + b4_ref[...]
    o_ref[...] = y.astype(o_ref.dtype)


def _round_up(x, m):
    return ((x + m - 1) // m) * m


def mf_fc_forward(params, user_idx, item_idx, *, tile_b=512):
    """Forward pass of MatrixFactorizationWithFC (eval mode)."""
    # --- glue: embedding gather + feature-wise concat (plain JAX, batch-major) ---
    user_emb = jnp.take(params["user_factors"], user_idx, axis=0)    # (B, F)
    item_emb = jnp.take(params["item_factors"], item_idx, axis=0)    # (B, F)
    x = jnp.concatenate([user_emb, item_emb], axis=1)                # (B, 2F)
    B, F2 = x.shape
    H1 = params["b1"].shape[0]
    H2 = params["b2"].shape[0]
    H3 = params["b3"].shape[0]

    # Tile-size policy: big tiles amortize the ~0.35us/step overhead, but keep
    # >= 2 tiles when the batch allows so v7x's two TensorCores split the grid.
    tile_b = max(128, min(tile_b, _round_up(B, 128)))
    while tile_b > 128 and pl.cdiv(B, tile_b) < 2:
        tile_b //= 2
    num_tiles = pl.cdiv(B, tile_b)
    b_pad = num_tiles * tile_b

    x = jnp.pad(x.astype(jnp.bfloat16), ((0, b_pad - B), (0, 0)))    # (B_pad, 2F)

    # bf16 weights for the MXU (f32 accumulation); biases / layer-4 column in f32.
    w1 = params["w1"].astype(jnp.bfloat16)
    w2 = params["w2"].astype(jnp.bfloat16)
    w3 = params["w3"].astype(jnp.bfloat16)

    def resident(shape):
        # Same block every grid step -> stays VMEM-resident across the grid.
        return pl.BlockSpec(shape, lambda i: (0, 0))

    weight_bytes = ((w1.size + w2.size + w3.size) * 2
                    + (params["b1"].size + params["b2"].size + params["b3"].size
                       + params["w4"].size + params["b4"].size) * 4)
    flops = 2 * b_pad * (F2 * H1 + H1 * H2 + H2 * H3 + H3)
    bytes_accessed = b_pad * F2 * 2 + b_pad * 4 + weight_bytes

    out = pl.pallas_call(
        _mlp_kernel,
        out_shape=jax.ShapeDtypeStruct((1, b_pad), jnp.float32),
        grid=(num_tiles,),
        in_specs=[
            pl.BlockSpec((tile_b, F2), lambda i: (i, 0)),   # [user ; item] embeddings tile
            resident((H1, F2)), resident((H1, 1)),
            resident((H2, H1)), resident((H2, 1)),
            resident((H3, H2)), resident((H3, 1)),
            resident((H3, 1)), resident((1, 1)),
        ],
        out_specs=pl.BlockSpec((1, tile_b), lambda i: (0, i)),
        compiler_params=pltpu.CompilerParams(dimension_semantics=("parallel",)),
        cost_estimate=pl.CostEstimate(flops=int(flops), transcendentals=0,
                                      bytes_accessed=int(bytes_accessed)),
    )(
        x,
        w1, params["b1"],
        w2, params["b2"],
        w3, params["b3"],
        params["w4"], params["b4"],
    )
    return out[0, :B]                                                # (B,)


def init_params(key, n_users, n_items, n_factors=64):
    """Deterministic parameter init mirroring the module __init__ shapes.

    Linear weights are stored in PyTorch (out_features, in_features) layout,
    biases as columns (out_features, 1).  W1's in_features axis is ordered
    [user features ; item features], matching the torch.cat in forward().
    """
    ks = jax.random.split(key, 10)

    def linear(kw, kb, fan_in, fan_out):
        bound = 1.0 / jnp.sqrt(fan_in)
        w = jax.random.uniform(kw, (fan_out, fan_in), jnp.float32, -bound, bound)
        b = jax.random.uniform(kb, (fan_out, 1), jnp.float32, -bound, bound)
        return w, b

    w1, b1 = linear(ks[2], ks[3], n_factors * 2, 256)
    w2, b2 = linear(ks[4], ks[5], 256, 128)
    w3, b3 = linear(ks[6], ks[7], 128, 64)
    w4, b4 = linear(ks[8], ks[9], 64, 1)

    return {
        # Embedding weights: uniform_(0, 0.05) as in the module.
        "user_factors": jax.random.uniform(ks[0], (n_users, n_factors), jnp.float32, 0.0, 0.05),
        "item_factors": jax.random.uniform(ks[1], (n_items, n_factors), jnp.float32, 0.0, 0.05),
        "w1": w1, "b1": b1,            # (256, 128) unsplit: [user ; item] ordering
        "w2": w2, "b2": b2,
        "w3": w3, "b3": b3,
        "w4": jnp.transpose(w4),       # (64, 1) column for the VPU reduction
        "b4": b4,                      # (1, 1)
    }


if __name__ == "__main__":
    key = jax.random.PRNGKey(0)
    n_users, n_items, n_factors = 16, 32, 64
    B = 8

    params = init_params(key, n_users, n_items, n_factors)

    ku, ki = jax.random.split(jax.random.PRNGKey(42))
    user_idx = jax.random.randint(ku, (B,), 0, n_users, dtype=jnp.int32)
    item_idx = jax.random.randint(ki, (B,), 0, n_items, dtype=jnp.int32)

    out = jax.jit(mf_fc_forward)(params, user_idx, item_idx)
    out = jax.block_until_ready(out)

    # Pure-JAX f32 reference (dropout is identity in eval mode), same math as the module.
    def ref(p, u, i):
        x = jnp.concatenate([p["user_factors"][u], p["item_factors"][i]], axis=1)
        h = jnp.maximum(x @ p["w1"].T + p["b1"][:, 0], 0.0)
        h = jnp.maximum(h @ p["w2"].T + p["b2"][:, 0], 0.0)
        h = jnp.maximum(h @ p["w3"].T + p["b3"][:, 0], 0.0)
        return h @ p["w4"][:, 0] + p["b4"][0, 0]                     # (B,)

    expected = ref(params, user_idx, item_idx)
    assert out.shape == (B,)
    # bf16 streaming / weights with f32 accumulation vs f32 reference -> loose tolerance.
    assert jnp.allclose(out, expected, atol=2e-2, rtol=2e-2), \
        float(jnp.max(jnp.abs(out - expected)))

    print("KERNEL_OK")
</pallas_src>

<mosaic_0001>
module attributes {stable_mosaic.version = 11 : i64} {
  func.func @_mlp_kernel(%arg0: i32, %arg1: memref<128x128xbf16, #tpu.memory_space<vmem>>, %arg2: memref<256x128xbf16, #tpu.memory_space<vmem>>, %arg3: memref<256x1xf32, #tpu.memory_space<vmem>>, %arg4: memref<128x256xbf16, #tpu.memory_space<vmem>>, %arg5: memref<128x1xf32, #tpu.memory_space<vmem>>, %arg6: memref<64x128xbf16, #tpu.memory_space<vmem>>, %arg7: memref<64x1xf32, #tpu.memory_space<vmem>>, %arg8: memref<64x1xf32, #tpu.memory_space<vmem>>, %arg9: memref<1x1xf32, #tpu.memory_space<vmem>>, %arg10: memref<1x128xf32, #tpu.memory_space<vmem>>) attributes {dimension_semantics = [#tpu.dimension_semantics<parallel>], iteration_bounds = array<i64: 1>, scalar_prefetch = 0 : i64, scratch_operands = 0 : i64, tpu.core_type = #tpu.core_type<tc>, window_params = [{transform_indices = @transform_0, window_bounds = array<i64: 128, 128>}, {pipeline_mode = #tpu.pipeline_mode<synchronous>, transform_indices = @transform_1, window_bounds = array<i64: 256, 128>}, {pipeline_mode = #tpu.pipeline_mode<synchronous>, transform_indices = @transform_2, window_bounds = array<i64: 256, 1>}, {pipeline_mode = #tpu.pipeline_mode<synchronous>, transform_indices = @transform_3, window_bounds = array<i64: 128, 256>}, {pipeline_mode = #tpu.pipeline_mode<synchronous>, transform_indices = @transform_4, window_bounds = array<i64: 128, 1>}, {pipeline_mode = #tpu.pipeline_mode<synchronous>, transform_indices = @transform_5, window_bounds = array<i64: 64, 128>}, {pipeline_mode = #tpu.pipeline_mode<synchronous>, transform_indices = @transform_6, window_bounds = array<i64: 64, 1>}, {pipeline_mode = #tpu.pipeline_mode<synchronous>, transform_indices = @transform_7, window_bounds = array<i64: 64, 1>}, {pipeline_mode = #tpu.pipeline_mode<synchronous>, transform_indices = @transform_8, window_bounds = array<i64: 1, 1>}, {transform_indices = @transform_9, window_bounds = array<i64: 1, 128>}]} {
    %c0 = arith.constant 0 : index
    %c0_0 = arith.constant 0 : index
    %0 = vector.load %arg2[%c0, %c0_0] : memref<256x128xbf16, #tpu.memory_space<vmem>>, vector<256x128xbf16>
    %c0_1 = arith.constant 0 : index
    %c0_2 = arith.constant 0 : index
    %1 = vector.load %arg1[%c0_1, %c0_2] : memref<128x128xbf16, #tpu.memory_space<vmem>>, vector<128x128xbf16>
    %cst = arith.constant dense<0.000000e+00> : vector<256x128xf32>
    %2 = tpu.matmul %0, %1, %cst {dimension_numbers = #tpu.dot_dimension_numbers<[1], [1], [0], [0], [0, 0, 1, 0], [], []>} : vector<256x128xbf16>, vector<128x128xbf16>, vector<256x128xf32> -> vector<256x128xf32>
    %c0_3 = arith.constant 0 : index
    %c0_4 = arith.constant 0 : index
    %3 = vector.load %arg3[%c0_3, %c0_4] : memref<256x1xf32, #tpu.memory_space<vmem>>, vector<256x1xf32>
    %4 = vector.broadcast %3 : vector<256x1xf32> to vector<256x128xf32>
    %5 = arith.addf %2, %4 : vector<256x128xf32>
    %cst_5 = arith.constant 0.000000e+00 : f32
    %6 = vector.broadcast %cst_5 : f32 to vector<256x128xf32>
    %7 = arith.maximumf %5, %6 : vector<256x128xf32>
    %c0_6 = arith.constant 0 : index
    %c0_7 = arith.constant 0 : index
    %8 = vector.load %arg4[%c0_6, %c0_7] : memref<128x256xbf16, #tpu.memory_space<vmem>>, vector<128x256xbf16>
    %9 = arith.truncf %7 : vector<256x128xf32> to vector<256x128xbf16>
    %cst_8 = arith.constant dense<0.000000e+00> : vector<128x128xf32>
    %10 = tpu.matmul %8, %9, %cst_8 {dimension_numbers = #tpu.dot_dimension_numbers<[1], [0], [0], [1], [0, 0, 1, 1], [], []>} : vector<128x256xbf16>, vector<256x128xbf16>, vector<128x128xf32> -> vector<128x128xf32>
    %c0_9 = arith.constant 0 : index
    %c0_10 = arith.constant 0 : index
    %11 = vector.load %arg5[%c0_9, %c0_10] : memref<128x1xf32, #tpu.memory_space<vmem>>, vector<128x1xf32>
    %12 = vector.broadcast %11 : vector<128x1xf32> to vector<128x128xf32>
    %13 = arith.addf %10, %12 : vector<128x128xf32>
    %cst_11 = arith.constant 0.000000e+00 : f32
    %14 = vector.broadcast %cst_11 : f32 to vector<128x128xf32>
    %15 = arith.maximumf %13, %14 : vector<128x128xf32>
    %c0_12 = arith.constant 0 : index
    %c0_13 = arith.constant 0 : index
    %16 = vector.load %arg6[%c0_12, %c0_13] : memref<64x128xbf16, #tpu.memory_space<vmem>>, vector<64x128xbf16>
    %17 = arith.truncf %15 : vector<128x128xf32> to vector<128x128xbf16>
    %cst_14 = arith.constant dense<0.000000e+00> : vector<64x128xf32>
    %18 = tpu.matmul %16, %17, %cst_14 {dimension_numbers = #tpu.dot_dimension_numbers<[1], [0], [0], [1], [0, 0, 1, 1], [], []>} : vector<64x128xbf16>, vector<128x128xbf16>, vector<64x128xf32> -> vector<64x128xf32>
    %c0_15 = arith.constant 0 : index
    %c0_16 = arith.constant 0 : index
    %19 = vector.load %arg7[%c0_15, %c0_16] : memref<64x1xf32, #tpu.memory_space<vmem>>, vector<64x1xf32>
    %20 = vector.broadcast %19 : vector<64x1xf32> to vector<64x128xf32>
    %21 = arith.addf %18, %20 : vector<64x128xf32>
    %cst_17 = arith.constant 0.000000e+00 : f32
    %22 = vector.broadcast %cst_17 : f32 to vector<64x128xf32>
    %23 = arith.maximumf %21, %22 : vector<64x128xf32>
    %c0_18 = arith.constant 0 : index
    %c0_19 = arith.constant 0 : index
    %24 = vector.load %arg8[%c0_18, %c0_19] : memref<64x1xf32, #tpu.memory_space<vmem>>, vector<64x1xf32>
    %25 = vector.broadcast %24 : vector<64x1xf32> to vector<64x128xf32>
    %26 = arith.mulf %23, %25 : vector<64x128xf32>
    %cst_20 = arith.constant dense<0.000000e+00> : vector<128xf32>
    %27 = vector.multi_reduction <add>, %26, %cst_20 [0] : vector<64x128xf32> to vector<128xf32>
    %28 = vector.shape_cast %27 : vector<128xf32> to vector<1x128xf32>
    %c0_21 = arith.constant 0 : index
    %c0_22 = arith.constant 0 : index
    %29 = vector.load %arg9[%c0_21, %c0_22] : memref<1x1xf32, #tpu.memory_space<vmem>>, vector<1x1xf32>
    %30 = vector.broadcast %29 : vector<1x1xf32> to vector<1x128xf32>
    %31 = arith.addf %28, %30 : vector<1x128xf32>
    %c0_23 = arith.constant 0 : index
    %c0_24 = arith.constant 0 : index
    %32 = vector.load %arg10[%c0_23, %c0_24] : memref<1x128xf32, #tpu.memory_space<vmem>>, vector<1x128xf32>
    tpu.vector_store %arg10[%c0_23, %c0_24], %31 {strides = array<i32>} : memref<1x128xf32, #tpu.memory_space<vmem>>, vector<1x128xf32>,
    return
  }
  func.func @transform_0(%arg0: i32) -> (i32, i32) {
    %c0_i32 = arith.constant 0 : i32
    %c0_i32_0 = arith.constant 0 : i32
    return %arg0, %c0_i32 : i32, i32
  }
  func.func @transform_1(%arg0: i32) -> (i32, i32) {
    %c0_i32 = arith.constant 0 : i32
    %c0_i32_0 = arith.constant 0 : i32
    %c0_i32_1 = arith.constant 0 : i32
    return %c0_i32, %c0_i32_0 : i32, i32
  }
  func.func @transform_2(%arg0: i32) -> (i32, i32) {
    %c0_i32 = arith.constant 0 : i32
    %c0_i32_0 = arith.constant 0 : i32
    %c0_i32_1 = arith.constant 0 : i32
    return %c0_i32, %c0_i32_0 : i32, i32
  }
  func.func @transform_3(%arg0: i32) -> (i32, i32) {
    %c0_i32 = arith.constant 0 : i32
    %c0_i32_0 = arith.constant 0 : i32
    %c0_i32_1 = arith.constant 0 : i32
    return %c0_i32, %c0_i32_0 : i32, i32
  }
  func.func @transform_4(%arg0: i32) -> (i32, i32) {
    %c0_i32 = arith.constant 0 : i32
    %c0_i32_0 = arith.constant 0 : i32
    %c0_i32_1 = arith.constant 0 : i32
    return %c0_i32, %c0_i32_0 : i32, i32
  }
  func.func @transform_5(%arg0: i32) -> (i32, i32) {
    %c0_i32 = arith.constant 0 : i32
    %c0_i32_0 = arith.constant 0 : i32
    %c0_i32_1 = arith.constant 0 : i32
    return %c0_i32, %c0_i32_0 : i32, i32
  }
  func.func @transform_6(%arg0: i32) -> (i32, i32) {
    %c0_i32 = arith.constant 0 : i32
    %c0_i32_0 = arith.constant 0 : i32
    %c0_i32_1 = arith.constant 0 : i32
    return %c0_i32, %c0_i32_0 : i32, i32
  }
  func.func @transform_7(%arg0: i32) -> (i32, i32) {
    %c0_i32 = arith.constant 0 : i32
    %c0_i32_0 = arith.constant 0 : i32
    %c0_i32_1 = arith.constant 0 : i32
    return %c0_i32, %c0_i32_0 : i32, i32
  }
  func.func @transform_8(%arg0: i32) -> (i32, i32) {
    %c0_i32 = arith.constant 0 : i32
    %c0_i32_0 = arith.constant 0 : i32
    %c0_i32_1 = arith.constant 0 : i32
    return %c0_i32, %c0_i32_0 : i32, i32
  }
  func.func @transform_9(%arg0: i32) -> (i32, i32) {
    %c0_i32 = arith.constant 0 : i32
    %c0_i32_0 = arith.constant 0 : i32
    return %c0_i32, %arg0 : i32, i32
  }
}

</mosaic_0001>

<bundles_post_ra>
// kernel: mf_fc_forward.1
= control target key start
LH: loop header
LB: loop body
LE: loop exit
PB: predicated region body
PF: predicated region fallthrough
CT: control target
= control target key end

     0   :  { %v1450_v1 = vmov 0   ;;  %s1903_s0 = inlined_call_operand.vmem [shape: bf16[128,128], index: 0, kind: input, shape index: {}]   ;;  %s1904_s2 = inlined_call_operand.vmem [shape: f32[256,1], index: 2, kind: input, shape index: {}]   ;;  %s1905_s8 = inlined_call_operand.<no memory space> [shape: f32[1,1], index: 8, kind: input, shape index: {}]   ;;  %s1906_s1 = inlined_call_operand.vmem [shape: bf16[256,128], index: 1, kind: input, shape index: {}]   ;;  %s1907_s4 = inlined_call_operand.vmem [shape: f32[128,1], index: 4, kind: input, shape index: {}]   ;;  %s1908_s6 = inlined_call_operand.vmem [shape: f32[64,1], index: 6, kind: input, shape index: {}]   ;;  %s1909_s7 = inlined_call_operand.vmem [shape: f32[64,1], index: 7, kind: input, shape index: {}]   ;;  %s1910_s3 = inlined_call_operand.vmem [shape: bf16[128,256], index: 3, kind: input, shape index: {}]   ;;  %s1911_s5 = inlined_call_operand.vmem [shape: bf16[64,128], index: 5, kind: input, shape index: {}]   ;;  %s1912_s9 = inlined_call_operand.vmem [shape: f32[1,128], index: 9, kind: output, shape index: {}]  }
   0x1   :  { %v1398_v0 = vld [vmem:[%s1903_s0] sm:$0xff]   ;;  %1396 = vset.pattern.permute.xlu0 %v1450_v1  ;;  %1397 = vset.pattern.permute.xlu1 %v1450_v1  ;;  %v1399_v2 = vld [vmem:[%s1903_s0 + $0x8] sm:$0xff]   ;;  %v14_v5 = vstv %s1905_s8  ;;  %v1400_v8 = vld [vmem:[%s1903_s0 + $0x10] sm:$0xff]  }
   0x2   :  { %1323 = vmatprep.subr.bf16.mxu0 %v1398_v0  ;;  %v99_v3 = vld [vmem:[%s1904_s2 + $0x80] sm:$0xff]  ;;  %v100_v6 = vld [vmem:[%s1904_s2 + $0x88] sm:$0xff]  ;;  %15 = vst [vmem:[#allocation2] sm:$0x1] %v14_v5  ;;  %v101_v9 = vld [vmem:[%s1904_s2 + $0x90] sm:$0xff] }
   0x3   :  { %1324 = vmatpush3.bf16.xpose.msra.mxu0 %v1398_v0  ;;  %197 = vperm.xlu0 %1396, %v99_v3   ;;  %v83_v4 = vld [vmem:[%s1904_s2] sm:$0xff]  ;;  %v84_v7 = vld [vmem:[%s1904_s2 + $0x8] sm:$0xff]  ;;  %v102_v10 = vld [vmem:[%s1904_s2 + $0x98] sm:$0xff] }
   0x4   :  { %1325 = vmatprep.subr.bf16.mxu0 %v1399_v2  ;;  %117 = vperm.xlu1 %1397, %v83_v4   ;;  %v85_v11 = vld [vmem:[%s1904_s2 + $0x10] sm:$0xff]  ;;  %v86_v12 = vld [vmem:[%s1904_s2 + $0x18] sm:$0xff]  ;;  %v1406_v13 = vld [vmem:[%s1906_s1] sm:$0xff]  }
   0x5   :  { %v1401_v14 = vld [vmem:[%s1903_s0 + $0x18] sm:$0xff]   ;;  %v103_v15 = vld [vmem:[%s1904_s2 + $0xa0] sm:$0xff]  ;;  %1339 = vmatprep.mubr.bf16.mxu0 %v1406_v13  ;;  %v104_v16 = vld [vmem:[%s1904_s2 + $0xa8] sm:$0xff] }
   0x6   :  { %v87_v17 = vld [vmem:[%s1904_s2 + $0x20] sm:$0xff]  ;;  %v88_v18 = vld [vmem:[%s1904_s2 + $0x28] sm:$0xff]  ;;  %v105_v20 = vld [vmem:[%s1904_s2 + $0xb0] sm:$0xff] }
   0x7   :  { %202 = vperm.xlu0 %1396, %v100_v6   ;;  %v1402_v19 = vld [vmem:[%s1903_s0 + $0x20] sm:$0xff]   ;;  %v106_v21 = vld [vmem:[%s1904_s2 + $0xb8] sm:$0xff]  ;;  %v89_v22 = vld [vmem:[%s1904_s2 + $0x30] sm:$0xff] }
   0x8   :  { %122 = vperm.xlu1 %1397, %v84_v7   ;;  %v90_v23 = vld [vmem:[%s1904_s2 + $0x38] sm:$0xff]  ;;  %v1403_v24 = vld [vmem:[%s1903_s0 + $0x28] sm:$0xff]   ;;  %v107_v25 = vld [vmem:[%s1904_s2 + $0xc0] sm:$0xff] }
   0x9   :  { %v108_v26 = vld [vmem:[%s1904_s2 + $0xc8] sm:$0xff]  ;;  %v91_v27 = vld [vmem:[%s1904_s2 + $0x40] sm:$0xff]  ;;  %v1404_v29 = vld [vmem:[%s1903_s0 + $0x30] sm:$0xff]  }
   0xa   :  { %v92_v28 = vld [vmem:[%s1904_s2 + $0x48] sm:$0xff]  ;;  %v109_v30 = vld [vmem:[%s1904_s2 + $0xd0] sm:$0xff]  ;;  %v110_v31 = vld [vmem:[%s1904_s2 + $0xd8] sm:$0xff] }
   0xb   :  { %1326 = vmatpush3.bf16.xpose.msra.mxu0 %v1399_v2  ;;  %207 = vperm.xlu0 %1396, %v101_v9   ;;  %v93_v32 = vld [vmem:[%s1904_s2 + $0x50] sm:$0xff]  ;;  %v94_v33 = vld [vmem:[%s1904_s2 + $0x58] sm:$0xff]  ;;  %v111_v35 = vld [vmem:[%s1904_s2 + $0xe0] sm:$0xff] }
   0xc   :  { %1327 = vmatprep.subr.bf16.mxu0 %v1400_v8  ;;  %212 = vperm.xlu1 %1397, %v102_v10   ;;  %v1405_v34 = vld [vmem:[%s1903_s0 + $0x38] sm:$0xff]   ;;  %v112_v36 = vld [vmem:[%s1904_s2 + $0xe8] sm:$0xff]  ;;  %v95_v37 = vld [vmem:[%s1904_s2 + $0x60] sm:$0xff] }
   0xd   :  { %v96_v38 = vld [vmem:[%s1904_s2 + $0x68] sm:$0xff]  ;;  %v113_v39 = vld [vmem:[%s1904_s2 + $0xf0] sm:$0xff]  ;;  %v114_v40 = vld [vmem:[%s1904_s2 + $0xf8] sm:$0xff] }
   0xe   :  { %v97_v41 = vld [vmem:[%s1904_s2 + $0x70] sm:$0xff]  ;;  %v1407_v42 = vld [vmem:[%s1906_s1 + $0x8] sm:$0xff]   ;;  %v98_v43 = vld [vmem:[%s1904_s2 + $0x78] sm:$0xff] }
   0xf   :  { %127 = vperm.xlu0 %1396, %v85_v11   ;;  %v1408_v44 = vld [vmem:[%s1906_s1 + $0x10] sm:$0xff]   ;;  %v644_v45 = vld [vmem:[%s1907_s4] sm:$0xff]  ;;  %v645_v46 = vld [vmem:[%s1907_s4 + $0x8] sm:$0xff] }
  0x10   :  { %132 = vperm.xlu1 %1397, %v86_v12   ;;  %v646_v47 = vld [vmem:[%s1907_s4 + $0x10] sm:$0xff]  ;;  %v1409_v48 = vld [vmem:[%s1906_s1 + $0x18] sm:$0xff]   ;;  %v1410_v50 = vld [vmem:[%s1906_s1 + $0x20] sm:$0xff]  }
  0x11   :  { %v647_v49 = vld [vmem:[%s1907_s4 + $0x18] sm:$0xff]  ;;  %v648_v51 = vld [vmem:[%s1907_s4 + $0x20] sm:$0xff]  ;;  %v649_v52 = vld [vmem:[%s1907_s4 + $0x28] sm:$0xff] }
  0x12   :  { %v650_v53 = vld [vmem:[%s1907_s4 + $0x30] sm:$0xff]  ;;  %v1411_v54 = vld [vmem:[%s1906_s1 + $0x28] sm:$0xff]   ;;  %v651_v55 = vld [vmem:[%s1907_s4 + $0x38] sm:$0xff] }
  0x13   :  { %1328 = vmatpush3.bf16.xpose.msra.mxu0 %v1400_v8  ;;  %217 = vperm.xlu0 %1396, %v103_v15   ;;  %v1412_v56 = vld [vmem:[%s1906_s1 + $0x30] sm:$0xff]   ;;  %v652_v57 = vld [vmem:[%s1907_s4 + $0x40] sm:$0xff]  ;;  %v653_v58 = vld [vmem:[%s1907_s4 + $0x48] sm:$0xff] }
  0x14   :  { %1329 = vmatprep.subr.bf16.mxu0 %v1401_v14  ;;  %222 = vperm.xlu1 %1397, %v104_v16   ;;  %v654_v59 = vld [vmem:[%s1907_s4 + $0x50] sm:$0xff]  ;;  %v1413_v60 = vld [vmem:[%s1906_s1 + $0x38] sm:$0xff]   ;;  %v1414_v62 = vld [vmem:[%s1906_s1 + $0x40] sm:$0xff]  }
  0x15   :  { %v655_v61 = vld [vmem:[%s1907_s4 + $0x58] sm:$0xff]  ;;  %v656_v63 = vld [vmem:[%s1907_s4 + $0x60] sm:$0xff]  ;;  %v657_v0 = vld [vmem:[%s1907_s4 + $0x68] sm:$0xff] }
  0x16   :  { %v658_v1 = vld [vmem:[%s1907_s4 + $0x70] sm:$0xff]  ;;  %v1415_v2 = vld [vmem:[%s1906_s1 + $0x48] sm:$0xff]   ;;  %v659_v3 = vld [vmem:[%s1907_s4 + $0x78] sm:$0xff] }
  0x17   :  { %137 = vperm.xlu0 %1396, %v87_v17   ;;  %v1416_v4 = vld [vmem:[%s1906_s1 + $0x50] sm:$0xff]   ;;  %v949_v5 = vld [vmem:[%s1908_s6] sm:$0xff]  ;;  %v950_v6 = vld [vmem:[%s1908_s6 + $0x8] sm:$0xff] }
  0x18   :  { %142 = vperm.xlu1 %1397, %v88_v18   ;;  %v951_v7 = vld [vmem:[%s1908_s6 + $0x10] sm:$0xff]  ;;  %v1417_v8 = vld [vmem:[%s1906_s1 + $0x58] sm:$0xff]   ;;  %v1418_v10 = vld [vmem:[%s1906_s1 + $0x60] sm:$0xff]  }
  0x19   :  { %v952_v9 = vld [vmem:[%s1908_s6 + $0x18] sm:$0xff]  ;;  %v1094_v11 = vld [vmem:[%s1909_s7] sm:$0xff]  ;;  %v1095_v12 = vld [vmem:[%s1909_s7 + $0x8] sm:$0xff] }
  0x1a   :  { %v953_v13 = vld [vmem:[%s1908_s6 + $0x20] sm:$0xff]  ;;  %v1096_v15 = vld [vmem:[%s1909_s7 + $0x10] sm:$0xff]  ;;  %v954_v17 = vld [vmem:[%s1908_s6 + $0x28] sm:$0xff] }
  0x1b   :  { %1330 = vmatpush3.bf16.xpose.msra.mxu0 %v1401_v14  ;;  %227 = vperm.xlu0 %1396, %v105_v20   ;;  %v1419_v14 = vld [vmem:[%s1906_s1 + $0x68] sm:$0xff]   ;;  %v1420_v16 = vld [vmem:[%s1906_s1 + $0x70] sm:$0xff]   ;;  %v1097_v18 = vld [vmem:[%s1909_s7 + $0x18] sm:$0xff] }
  0x1c   :  { %1331 = vmatprep.subr.bf16.mxu0 %v1402_v19  ;;  %232 = vperm.xlu1 %1397, %v106_v21   ;;  %v1421_v20 = vld [vmem:[%s1906_s1 + $0x78] sm:$0xff]   ;;  %v1098_v21 = vld [vmem:[%s1909_s7 + $0x20] sm:$0xff] }
  0x1f   :  { %147 = vperm.xlu0 %1396, %v89_v22   ;;  %v956_v22 = vld [vmem:[%s1908_s6 + $0x38] sm:$0xff] }
  0x20   :  { %152 = vperm.xlu1 %1397, %v90_v23   ;;  %v1099_v23 = vld [vmem:[%s1909_s7 + $0x28] sm:$0xff] }
  0x23   :  { %1332 = vmatpush3.bf16.xpose.msra.mxu0 %v1402_v19  ;;  %237 = vperm.xlu0 %1396, %v107_v25   ;;  %v955_v19 = vld [vmem:[%s1908_s6 + $0x30] sm:$0xff]  ;;  %v1101_v25 = vld [vmem:[%s1909_s7 + $0x38] sm:$0xff] }
  0x24   :  { %1333 = vmatprep.subr.bf16.mxu0 %v1403_v24  ;;  %242 = vperm.xlu1 %1397, %v108_v26   ;;  %v1163_v26 = vld [vmem:[#allocation2] sm:$0x1] }
  0x27   :  { %157 = vperm.xlu0 %1396, %v91_v27  }
  0x28   :  { %162 = vperm.xlu1 %1397, %v92_v28  }
  0x2b   :  { %1334 = vmatpush3.bf16.xpose.msra.mxu0 %v1403_v24  ;;  %247 = vperm.xlu0 %1396, %v109_v30   ;;  %v1100_v24 = vld [vmem:[%s1909_s7 + $0x30] sm:$0xff] }
  0x2c   :  { %1335 = vmatprep.subr.bf16.mxu0 %v1404_v29  ;;  %252 = vperm.xlu1 %1397, %v110_v31   ;;  %v1424_v31 = vld [vmem:[%s1910_s3 + $0x4] ss:$8 sps:$4 sm:$0xff]  }
  0x2d   :  { %852 = vmatprep.mubr.bf16.mxu1 %v1424_v31 }
  0x2f   :  { %167 = vperm.xlu0 %1396, %v93_v32  }
  0x30   :  { %172 = vperm.xlu1 %1397, %v94_v33  }
  0x33   :  { %1336 = vmatpush3.bf16.xpose.msra.mxu0 %v1404_v29  ;;  %257 = vperm.xlu0 %1396, %v111_v35  }
  0x34   :  { %1337 = vmatprep.subr.bf16.mxu0 %v1405_v34  ;;  %262 = vperm.xlu1 %1397, %v112_v36  }
  0x37   :  { %177 = vperm.xlu0 %1396, %v95_v37  }
  0x38   :  { %182 = vperm.xlu1 %1397, %v96_v38  }
  0x3b   :  { %1338 = vmatpush3.bf16.xpose.msra.mxu0 %v1405_v34  ;;  %267 = vperm.xlu0 %1396, %v113_v39  }
  0x3c   :  { %272 = vperm.xlu1 %1397, %v114_v40  }
  0x3f   :  { %187 = vperm.xlu0 %1396, %v97_v41  }
  0x40   :  { %192 = vperm.xlu1 %1397, %v98_v43  }
  0x42   :  { %1340 = vmatmul.mubr.bf16.vlgmr.msra.gmra.mrb[0].mxu0 %v1407_v42 }
  0x43   :  { %1343 = vmatprep.mubr.bf16.mxu0 %v1408_v44  ;;  %662 = vperm.xlu0 %1396, %v644_v45  }
  0x44   :  { %667 = vperm.xlu1 %1397, %v645_v46  }
  0x47   :  { %672 = vperm.xlu0 %1396, %v646_v47  }
  0x48   :  { %677 = vperm.xlu1 %1397, %v647_v49  }
  0x4a   :  { %1344 = vmatmul.mubr.bf16.gmra.mrb[4].mxu0 %v1409_v48 }
  0x4b   :  { %1347 = vmatprep.mubr.bf16.mxu0 %v1410_v50  ;;  %682 = vperm.xlu0 %1396, %v648_v51  }
  0x4c   :  { %687 = vperm.xlu1 %1397, %v649_v52  }
  0x4f   :  { %692 = vperm.xlu0 %1396, %v650_v53  }
  0x50   :  { %697 = vperm.xlu1 %1397, %v651_v55  }
  0x52   :  { %1348 = vmatmul.mubr.bf16.gmra.mrb[8].mxu0 %v1411_v54 }
  0x53   :  { %1351 = vmatprep.mubr.bf16.mxu0 %v1412_v56  ;;  %702 = vperm.xlu0 %1396, %v652_v57  }
  0x54   :  { %707 = vperm.xlu1 %1397, %v653_v58  }
  0x57   :  { %712 = vperm.xlu0 %1396, %v654_v59  }
  0x58   :  { %717 = vperm.xlu1 %1397, %v655_v61  }
  0x5a   :  { %1352 = vmatmul.mubr.bf16.gmra.mrb[12].mxu0 %v1413_v60 }
  0x5b   :  { %1355 = vmatprep.mubr.bf16.mxu0 %v1414_v62  ;;  %722 = vperm.xlu0 %1396, %v656_v63  }
  0x5c   :  { %727 = vperm.xlu1 %1397, %v657_v0  }
  0x5f   :  { %732 = vperm.xlu0 %1396, %v658_v1  }
  0x60   :  { %737 = vperm.xlu1 %1397, %v659_v3  }
  0x62   :  { %1356 = vmatmul.mubr.bf16.gmra.mrb[16].mxu0 %v1415_v2 }
  0x63   :  { %1359 = vmatprep.mubr.bf16.mxu0 %v1416_v4  ;;  %959 = vperm.xlu0 %1396, %v949_v5  }
  0x64   :  { %964 = vperm.xlu1 %1397, %v950_v6  }
  0x67   :  { %969 = vperm.xlu0 %1396, %v951_v7  }
  0x68   :  { %974 = vperm.xlu1 %1397, %v952_v9  }
  0x6a   :  { %1360 = vmatmul.mubr.bf16.gmra.mrb[20].mxu0 %v1417_v8 }
  0x6b   :  { %1363 = vmatprep.mubr.bf16.mxu0 %v1418_v10  ;;  %1104 = vperm.xlu0 %1396, %v1094_v11  }
  0x6c   :  { %1109 = vperm.xlu1 %1397, %v1095_v12  }
  0x6f   :  { %979 = vperm.xlu0 %1396, %v953_v13  }
  0x70   :  { %1114 = vperm.xlu1 %1397, %v1096_v15  }
  0x72   :  { %1364 = vmatmul.mubr.bf16.gmra.mrb[24].mxu0 %v1419_v14 }
  0x73   :  { %1367 = vmatprep.mubr.bf16.mxu0 %v1420_v16  ;;  %984 = vperm.xlu0 %1396, %v954_v17  }
  0x74   :  { %1119 = vperm.xlu1 %1397, %v1097_v18  }
  0x77   :  { %989 = vperm.xlu0 %1396, %v955_v19  }
  0x78   :  { %1124 = vperm.xlu1 %1397, %v1098_v21  }
  0x7a   :  { %1368 = vmatmul.mubr.bf16.gmra.mrb[28].mxu0 %v1421_v20 }
  0x7b   :  { %994 = vperm.xlu0 %1396, %v956_v22  }
  0x7c   :  { %1129 = vperm.xlu1 %1397, %v1099_v23  }
  0x7f   :  { %1134 = vperm.xlu0 %1396, %v1100_v24  }
  0x80   :  { %1139 = vperm.xlu1 %1397, %v1101_v25  }
  0x82   :  { %v1768_v27 = vpop.permute.xlu0 %197 }
  0x83   :  { %1166 = vperm.xlu0 %1396, %v1163_v26   ;;  %v118_v28 = vpop.permute.xlu1 %117 }
  0x86   :  { %v1770_v29 = vpop.permute.xlu0 %202 }
  0x87   :  { %v123_v30 = vpop.permute.xlu1 %122 }
  0x8a   :  { %v1775_v32 = vpop.permute.xlu0 %207 }
  0x8b   :  { %v1777_v33 = vpop.permute.xlu1 %212 }
  0x8e   :  { %v128_v34 = vpop.permute.xlu0 %127 }
  0x8f   :  { %v133_v35 = vpop.permute.xlu1 %132 }
  0x92   :  { %v1779_v36 = vpop.permute.xlu0 %217 }
  0x93   :  { %v1781_v37 = vpop.permute.xlu1 %222 }
  0x96   :  { %v138_v38 = vpop.permute.xlu0 %137 }
  0x97   :  { %v143_v39 = vpop.permute.xlu1 %142 }
  0x9a   :  { %v1783_v40 = vpop.permute.xlu0 %227 }
  0x9b   :  { %v1785_v41 = vpop.permute.xlu1 %232 }
  0x9e   :  { %v148_v42 = vpop.permute.xlu0 %147 }
  0x9f   :  { %v153_v43 = vpop.permute.xlu1 %152 }
  0xa2   :  { %v1787_v44 = vpop.permute.xlu0 %237 }
  0xa3   :  { %v1789_v45 = vpop.permute.xlu1 %242 }
  0xa6   :  { %v158_v46 = vpop.permute.xlu0 %157 }
  0xa7   :  { %v163_v47 = vpop.permute.xlu1 %162 }
  0xaa   :  { %v1791_v48 = vpop.permute.xlu0 %247 }
  0xab   :  { %v1793_v49 = vpop.permute.xlu1 %252 }
  0xae   :  { %v168_v50 = vpop.permute.xlu0 %167 }
  0xaf   :  { %v173_v54 = vpop.permute.xlu1 %172 }
  0xb2   :  { %v1795_v62 = vpop.permute.xlu0 %257 }
  0xb3   :  { %v1799_v2 = vpop.permute.xlu1 %262 }
  0xb6   :  { %v178_v11 = vpop.permute.xlu0 %177 }
  0xb7   :  { %v183_v15 = vpop.permute.xlu1 %182 }
  0xba   :  { %v1807_v23 = vpop.permute.xlu0 %267 }
 0x115   :  { %v1341_v51 = vpop.f32.mrb[0].mxu0 }
 0x116   :  { %v462_v52 = vadd.f32 %v1341_v51, %v128_v34  ;;  %v453_v53 = vpop.f32.mrb[1].mxu0 }
 0x117   :  { %v454_v55 = vadd.f32 %v453_v53, %v118_v28  ;;  %v1342_v56 = vpop.f32.mrb[2].mxu0 }
 0x118   :  { %v465_v57 = vadd.f32 %v1342_v56, %v133_v35  ;;  %v456_v58 = vpop.f32.mrb[3].mxu0  ;;  %v582_v60 = vmax.f32 %v462_v52, 0.0 }
 0x119   :  { %v457_v59 = vadd.f32 %v456_v58, %v123_v30  ;;  %v580_v63 = vmax.f32 %v454_v55, 0.0  ;;  %v1809_v30 = vpop.permute.xlu1 %272 }
 0x11a   :  { %v583_v61 = vmax.f32 %v465_v57, 0.0 }
 0x11b   :  { %v581_v0 = vmax.f32 %v457_v59, 0.0 }
 0x11c   :  { %v1797_v1 = vpack.c.bf16 %v583_v61, %v582_v60 }
 0x11d   :  { %v1345_v3 = vpop.f32.mrb[4].mxu0  ;;  %v1801_v4 = vpack.c.bf16 %v581_v0, %v580_v63  ;;  %v193_v55 = vpop.permute.xlu1 %192 }
 0x11e   :  { %v478_v5 = vadd.f32 %v1345_v3, %v148_v42  ;;  %v469_v6 = vpop.f32.mrb[5].mxu0 }
 0x11f   :  { %v470_v7 = vadd.f32 %v469_v6, %v138_v38  ;;  %v1346_v8 = vpop.f32.mrb[6].mxu0 }
 0x120   :  { %v481_v9 = vadd.f32 %v1346_v8, %v153_v43  ;;  %v472_v10 = vpop.f32.mrb[7].mxu0  ;;  %v586_v13 = vmax.f32 %v478_v5, 0.0  ;;  %v188_v43 = vpop.permute.xlu0 %187 }
 0x121   :  { %v473_v12 = vadd.f32 %v472_v10, %v143_v39  ;;  %v584_v16 = vmax.f32 %v470_v7, 0.0 }
 0x122   :  { %v587_v14 = vmax.f32 %v481_v9, 0.0 }
 0x123   :  { %v585_v17 = vmax.f32 %v473_v12, 0.0 }
 0x124   :  { %v1803_v18 = vpack.c.bf16 %v587_v14, %v586_v13 }
 0x125   :  { %v1805_v19 = vpack.c.bf16 %v585_v17, %v584_v16  ;;  %v1349_v20 = vpop.f32.mrb[8].mxu0 }
 0x126   :  { %v494_v21 = vadd.f32 %v1349_v20, %v168_v50  ;;  %v485_v22 = vpop.f32.mrb[9].mxu0 }
 0x127   :  { %v486_v24 = vadd.f32 %v485_v22, %v158_v46  ;;  %v1350_v25 = vpop.f32.mrb[10].mxu0 }
 0x128   :  { %v497_v26 = vadd.f32 %v1350_v25, %v173_v54  ;;  %v488_v28 = vpop.f32.mrb[11].mxu0  ;;  %v590_v34 = vmax.f32 %v494_v21, 0.0 }
 0x129   :  { %v489_v31 = vadd.f32 %v488_v28, %v163_v47  ;;  %v588_v38 = vmax.f32 %v486_v24, 0.0 }
 0x12a   :  { %v591_v35 = vmax.f32 %v497_v26, 0.0 }
 0x12b   :  { %v589_v39 = vmax.f32 %v489_v31, 0.0 }
 0x12c   :  { %v1811_v42 = vpack.c.bf16 %v591_v35, %v590_v34 }
 0x12d   :  { %v1813_v51 = vpack.c.bf16 %v589_v39, %v588_v38  ;;  %v1353_v50 = vpop.f32.mrb[12].mxu0 }
 0x12e   :  { %v510_v52 = vadd.f32 %v1353_v50, %v188_v43  ;;  %v501_v53 = vpop.f32.mrb[13].mxu0 }
 0x12f   :  { %v502_v46 = vadd.f32 %v501_v53, %v178_v11  ;;  %v1354_v56 = vpop.f32.mrb[14].mxu0 }
 0x130   :  { %v513_v54 = vadd.f32 %v1354_v56, %v193_v55  ;;  %v504_v57 = vpop.f32.mrb[15].mxu0  ;;  %v594_v59 = vmax.f32 %v510_v52, 0.0 }
 0x131   :  { %v505_v58 = vadd.f32 %v504_v57, %v183_v15  ;;  %v592_v60 = vmax.f32 %v502_v46, 0.0 }
 0x132   :  { %v595_v47 = vmax.f32 %v513_v54, 0.0 }
 0x133   :  { %v593_v61 = vmax.f32 %v505_v58, 0.0 }
 0x134   :  { %v1815_v63 = vpack.c.bf16 %v595_v47, %v594_v59 }
 0x135   :  { %v1817_v0 = vpack.c.bf16 %v593_v61, %v592_v60  ;;  %v1357_v3 = vpop.f32.mrb[16].mxu0  ;;  %v1431_v61 = vld [vmem:[%s1910_s3 + $0x34] ss:$8 sps:$4 sm:$0xff]  }
 0x136   :  { %v526_v5 = vadd.f32 %v1357_v3, %v1775_v32  ;;  %v517_v6 = vpop.f32.mrb[17].mxu0  ;;  %v1436_v3 = vld [vmem:[%s1910_s3 + $0x40] ss:$8 sps:$4 sm:$0xff]  }
 0x137   :  { %v518_v7 = vadd.f32 %v517_v6, %v1768_v27  ;;  %v1358_v8 = vpop.f32.mrb[18].mxu0  ;;  %v1439_v6 = vld [vmem:[%s1910_s3 + $0x50] ss:$8 sps:$4 sm:$0xff]  }
 0x138   :  { %v529_v9 = vadd.f32 %v1358_v8, %v1777_v33  ;;  %v520_v10 = vpop.f32.mrb[19].mxu0  ;;  %v598_v12 = vmax.f32 %v526_v5, 0.0  ;;  %v1437_v5 = vld [vmem:[%s1910_s3 + $0x54] ss:$8 sps:$4 sm:$0xff]   ;;  %v1442_v8 = vld [vmem:[%s1910_s3 + $0x60] ss:$8 sps:$4 sm:$0xff]  }
 0x139   :  { %v521_v11 = vadd.f32 %v520_v10, %v1770_v29  ;;  %v596_v14 = vmax.f32 %v518_v7, 0.0  ;;  %v1440_v7 = vld [vmem:[%s1910_s3 + $0x64] ss:$8 sps:$4 sm:$0xff]   ;;  %v1445_v10 = vld [vmem:[%s1910_s3 + $0x70] ss:$8 sps:$4 sm:$0xff]  }
 0x13a   :  { %v599_v13 = vmax.f32 %v529_v9, 0.0  ;;  %v1443_v9 = vld [vmem:[%s1910_s3 + $0x74] ss:$8 sps:$4 sm:$0xff]  }
 0x13b   :  { %v597_v15 = vmax.f32 %v521_v11, 0.0  ;;  %v1446_v11 = vld [vmem:[%s1911_s5] sm:$0xff]  }
 0x13c   :  { %v637_v16 = vpack.c.bf16 %v599_v13, %v598_v12 }
 0x13d   :  { %v1361_v17 = vpop.f32.mrb[20].mxu0  ;;  %v636_v20 = vpack.c.bf16 %v597_v15, %v596_v14 }
 0x13e   :  { %v542_v21 = vadd.f32 %v1361_v17, %v1783_v40  ;;  %v533_v22 = vpop.f32.mrb[21].mxu0 }
 0x13f   :  { %v534_v32 = vadd.f32 %v533_v22, %v1779_v36  ;;  %v1362_v24 = vpop.f32.mrb[22].mxu0  ;;  %1247 = vmatprep.subr.bf16.mxu1 %v636_v20  ;;  %v668_v22 = vpop.permute.xlu1 %667 }
 0x140   :  { %v545_v27 = vadd.f32 %v1362_v24, %v1785_v41  ;;  %v536_v33 = vpop.f32.mrb[23].mxu0  ;;  %1248 = vmatpush3.bf16.msra.mxu1 %v1801_v4  ;;  %v602_v25 = vmax.f32 %v542_v21, 0.0 }
 0x141   :  { %v537_v29 = vadd.f32 %v536_v33, %v1781_v37  ;;  %1249 = vmatprep.subr.bf16.mxu1 %v637_v16  ;;  %v600_v28 = vmax.f32 %v534_v32, 0.0  ;;  %v663_v16 = vpop.permute.xlu0 %662 }
 0x142   :  { %v603_v26 = vmax.f32 %v545_v27, 0.0 }
 0x143   :  { %v601_v31 = vmax.f32 %v537_v29, 0.0 }
 0x144   :  { %v639_v34 = vpack.c.bf16 %v603_v26, %v602_v25  ;;  %1250 = vmatpush3.bf16.msra.mxu1 %v1797_v1 }
 0x145   :  { %v638_v40 = vpack.c.bf16 %v601_v31, %v600_v28  ;;  %v1365_v35 = vpop.f32.mrb[24].mxu0  ;;  %v673_v31 = vpop.permute.xlu0 %672 }
 0x146   :  { %v558_v36 = vadd.f32 %v1365_v35, %v1791_v48  ;;  %v549_v38 = vpop.f32.mrb[25].mxu0 }
 0x147   :  { %v550_v41 = vadd.f32 %v549_v38, %v1787_v44  ;;  %v1366_v39 = vpop.f32.mrb[26].mxu0  ;;  %1251 = vmatprep.subr.bf16.mxu1 %v638_v40 }
 0x148   :  { %v561_v4 = vadd.f32 %v1366_v39, %v1793_v49  ;;  %v552_v37 = vpop.f32.mrb[27].mxu0  ;;  %1252 = vmatpush3.bf16.msra.mxu1 %v1805_v19  ;;  %v606_v50 = vmax.f32 %v558_v36, 0.0  ;;  %v678_v36 = vpop.permute.xlu1 %677 }
 0x149   :  { %v553_v43 = vadd.f32 %v552_v37, %v1789_v45  ;;  %1253 = vmatprep.subr.bf16.mxu1 %v639_v34  ;;  %v604_v1 = vmax.f32 %v550_v41, 0.0 }
 0x14a   :  { %v607_v52 = vmax.f32 %v561_v4, 0.0 }
 0x14b   :  { %v605_v53 = vmax.f32 %v553_v43, 0.0 }
 0x14c   :  { %v641_v55 = vpack.c.bf16 %v607_v52, %v606_v50  ;;  %1254 = vmatpush3.bf16.msra.mxu1 %v1803_v18 }
 0x14d   :  { %v640_v48 = vpack.c.bf16 %v605_v53, %v604_v1  ;;  %v1369_v46 = vpop.f32.mrb[28].mxu0  ;;  %v683_v1 = vpop.permute.xlu0 %682 }
 0x14e   :  { %v574_v44 = vadd.f32 %v1369_v46, %v1807_v23  ;;  %v565_v56 = vpop.f32.mrb[29].mxu0  ;;  %v688_v46 = vpop.permute.xlu1 %687 }
 0x14f   :  { %v566_v49 = vadd.f32 %v565_v56, %v1795_v62  ;;  %v1370_v54 = vpop.f32.mrb[30].mxu0  ;;  %1255 = vmatprep.subr.bf16.mxu1 %v640_v48  ;;  %v1422_v62 = vld [vmem:[%s1910_s3] ss:$8 sps:$4 sm:$0xff]  }
 0x150   :  { %v577_v19 = vadd.f32 %v1370_v54, %v1809_v30  ;;  %v568_v45 = vpop.f32.mrb[31].mxu0  ;;  %1256 = vmatpush3.bf16.msra.mxu1 %v1813_v51  ;;  %v610_v58 = vmax.f32 %v574_v44, 0.0  ;;  %v1427_v30 = vld [vmem:[%s1910_s3 + $0x10] ss:$8 sps:$4 sm:$0xff]   ;;  %v1430_v51 = vld [vmem:[%s1910_s3 + $0x20] ss:$8 sps:$4 sm:$0xff]  }
 0x151   :  { %v569_v57 = vadd.f32 %v568_v45, %v1799_v2  ;;  %1257 = vmatprep.subr.bf16.mxu1 %v641_v55  ;;  %v608_v18 = vmax.f32 %v566_v49, 0.0  ;;  %v1425_v2 = vld [vmem:[%s1910_s3 + $0x14] ss:$8 sps:$4 sm:$0xff]  }
 0x152   :  { %v611_v59 = vmax.f32 %v577_v19, 0.0 }
 0x153   :  { %v609_v47 = vmax.f32 %v569_v57, 0.0 }
 0x154   :  { %v643_v60 = vpack.c.bf16 %v611_v59, %v610_v58  ;;  %1258 = vmatpush3.bf16.msra.mxu1 %v1811_v42  ;;  %v1428_v42 = vld [vmem:[%s1910_s3 + $0x24] ss:$8 sps:$4 sm:$0xff]   ;;  %v693_v59 = vpop.permute.xlu0 %692 }
 0x155   :  { %v642_v23 = vpack.c.bf16 %v609_v47, %v608_v18 }
 0x157   :  { %1259 = vmatprep.subr.bf16.mxu1 %v642_v23  ;;  %v698_v23 = vpop.permute.xlu1 %697 }
 0x158   :  { %1260 = vmatpush3.bf16.msra.mxu1 %v1817_v0  ;;  %v1434_v0 = vld [vmem:[%s1910_s3 + $0x44] ss:$8 sps:$4 sm:$0xff]  }
 0x159   :  { %1261 = vmatprep.subr.bf16.mxu1 %v643_v60 }
 0x15c   :  { %1262 = vmatpush3.bf16.msra.mxu1 %v1815_v63  ;;  %v1433_v63 = vld [vmem:[%s1910_s3 + $0x30] ss:$8 sps:$4 sm:$0xff]  }
 0x15f   :  { %853 = vmatmul.mubr.bf16.vlgmr.msra.gmra.mrb[0].mxu1 %v1422_v62 }
 0x160   :  { %860 = vmatprep.mubr.bf16.mxu1 %v1425_v2 }
 0x167   :  { %861 = vmatmul.mubr.bf16.gmra.mrb[4].mxu1 %v1427_v30 }
 0x168   :  { %868 = vmatprep.mubr.bf16.mxu1 %v1428_v42 }
 0x16f   :  { %869 = vmatmul.mubr.bf16.gmra.mrb[8].mxu1 %v1430_v51 }
 0x170   :  { %876 = vmatprep.mubr.bf16.mxu1 %v1431_v61 }
 0x177   :  { %877 = vmatmul.mubr.bf16.gmra.mrb[12].mxu1 %v1433_v63 }
 0x178   :  { %884 = vmatprep.mubr.bf16.mxu1 %v1434_v0 }
 0x17f   :  { %885 = vmatmul.mubr.bf16.gmra.mrb[16].mxu1 %v1436_v3  ;;  %v703_v3 = vpop.permute.xlu0 %702 }
 0x180   :  { %892 = vmatprep.mubr.bf16.mxu1 %v1437_v5 }
 0x187   :  { %893 = vmatmul.mubr.bf16.gmra.mrb[20].mxu1 %v1439_v6 }
 0x188   :  { %900 = vmatprep.mubr.bf16.mxu1 %v1440_v7 }
 0x18f   :  { %901 = vmatmul.mubr.bf16.gmra.mrb[24].mxu1 %v1442_v8  ;;  %v708_v8 = vpop.permute.xlu1 %707 }
 0x190   :  { %908 = vmatprep.mubr.bf16.mxu1 %v1443_v9 }
 0x197   :  { %909 = vmatmul.mubr.bf16.gmra.mrb[28].mxu1 %v1445_v10 }
 0x198   :  { %1387 = vmatprep.mubr.bf16.mxu1 %v1446_v11 }
 0x232   :  { %v1263_v12 = vpop.f32.mrb[0].mxu1 }
 0x233   :  { %v1264_v13 = vpop.f32.mrb[1].mxu1 }
 0x234   :  { %v1265_v14 = vadd.f32 %v1264_v13, %v1263_v12  ;;  %v1266_v15 = vpop.f32.mrb[2].mxu1 }
 0x235   :  { %v1267_v17 = vpop.f32.mrb[3].mxu1 }
 0x236   :  { %v855_v20 = vadd.f32 %v1265_v14, %v663_v16  ;;  %v1268_v21 = vadd.f32 %v1267_v17, %v1266_v15  ;;  %v713_v17 = vpop.permute.xlu0 %712 }
 0x238   :  { %v858_v32 = vadd.f32 %v1268_v21, %v668_v22  ;;  %v917_v24 = vmax.f32 %v855_v20, 0.0 }
 0x23a   :  { %v918_v27 = vmax.f32 %v858_v32, 0.0  ;;  %v1269_v33 = vpop.f32.mrb[4].mxu1  ;;  %v718_v32 = vpop.permute.xlu1 %717 }
 0x23b   :  { %v1270_v29 = vpop.f32.mrb[5].mxu1 }
 0x23c   :  { %v1271_v25 = vadd.f32 %v1270_v29, %v1269_v33  ;;  %v1272_v26 = vpop.f32.mrb[6].mxu1  ;;  %v941_v28 = vpack.c.bf16 %v918_v27, %v917_v24 }
 0x23d   :  { %v1273_v34 = vpop.f32.mrb[7].mxu1 }
 0x23e   :  { %v863_v40 = vadd.f32 %v1271_v25, %v673_v31  ;;  %v1274_v35 = vadd.f32 %v1273_v34, %v1272_v26  ;;  %1371 = vmatprep.subr.bf16.mxu1 %v941_v28  ;;  %v723_v34 = vpop.permute.xlu0 %722 }
 0x23f   :  { %1372 = vmatpush3.bf16.msra.mxu1 %v941_v28 }
 0x240   :  { %v866_v38 = vadd.f32 %v1274_v35, %v678_v36  ;;  %v919_v41 = vmax.f32 %v863_v40, 0.0 }
 0x242   :  { %v920_v39 = vmax.f32 %v866_v38, 0.0  ;;  %v1275_v4 = vpop.f32.mrb[8].mxu1  ;;  %v728_v38 = vpop.permute.xlu1 %727 }
 0x243   :  { %v1276_v37 = vpop.f32.mrb[9].mxu1 }
 0x244   :  { %v1277_v43 = vadd.f32 %v1276_v37, %v1275_v4  ;;  %v1278_v50 = vpop.f32.mrb[10].mxu1  ;;  %v942_v52 = vpack.c.bf16 %v920_v39, %v919_v41 }
 0x245   :  { %v1279_v53 = vpop.f32.mrb[11].mxu1 }
 0x246   :  { %v871_v55 = vadd.f32 %v1277_v43, %v683_v1  ;;  %v1280_v48 = vadd.f32 %v1279_v53, %v1278_v50  ;;  %1373 = vmatprep.subr.bf16.mxu1 %v942_v52  ;;  %v733_v53 = vpop.permute.xlu0 %732 }
 0x247   :  { %1374 = vmatpush3.bf16.msra.mxu1 %v942_v52 }
 0x248   :  { %v874_v44 = vadd.f32 %v1280_v48, %v688_v46  ;;  %v921_v56 = vmax.f32 %v871_v55, 0.0 }
 0x24a   :  { %v922_v49 = vmax.f32 %v874_v44, 0.0  ;;  %v1281_v54 = vpop.f32.mrb[12].mxu1  ;;  %v738_v44 = vpop.permute.xlu1 %737 }
 0x24b   :  { %v1282_v19 = vpop.f32.mrb[13].mxu1 }
 0x24c   :  { %v1283_v45 = vadd.f32 %v1282_v19, %v1281_v54  ;;  %v1284_v57 = vpop.f32.mrb[14].mxu1  ;;  %v943_v58 = vpack.c.bf16 %v922_v49, %v921_v56 }
 0x24d   :  { %v1285_v18 = vpop.f32.mrb[15].mxu1 }
 0x24e   :  { %v879_v47 = vadd.f32 %v1283_v45, %v693_v59  ;;  %v1286_v60 = vadd.f32 %v1285_v18, %v1284_v57  ;;  %1375 = vmatprep.subr.bf16.mxu1 %v943_v58  ;;  %v1447_v45 = vld [vmem:[%s1911_s5 + $0x8] sm:$0xff]   ;;  %v1448_v57 = vld [vmem:[%s1911_s5 + $0x10] sm:$0xff]   ;;  %v960_v59 = vpop.permute.xlu0 %959  ;;  %v965_v18 = vpop.permute.xlu1 %964 }
 0x24f   :  { %1376 = vmatpush3.bf16.msra.mxu1 %v943_v58  ;;  %v1449_v58 = vld [vmem:[%s1911_s5 + $0x18] sm:$0xff]  }
 0x250   :  { %v882_v62 = vadd.f32 %v1286_v60, %v698_v23  ;;  %v923_v2 = vmax.f32 %v879_v47, 0.0 }
 0x252   :  { %v924_v30 = vmax.f32 %v882_v62, 0.0  ;;  %v1287_v42 = vpop.f32.mrb[16].mxu1  ;;  %v970_v47 = vpop.permute.xlu0 %969 }
 0x253   :  { %v1288_v51 = vpop.f32.mrb[17].mxu1  ;;  %v975_v60 = vpop.permute.xlu1 %974 }
 0x254   :  { %v1289_v61 = vadd.f32 %v1288_v51, %v1287_v42  ;;  %v1290_v63 = vpop.f32.mrb[18].mxu1  ;;  %v944_v0 = vpack.c.bf16 %v924_v30, %v923_v2 }
 0x255   :  { %v1291_v5 = vpop.f32.mrb[19].mxu1 }
 0x256   :  { %v887_v6 = vadd.f32 %v1289_v61, %v703_v3  ;;  %v1292_v7 = vadd.f32 %v1291_v5, %v1290_v63  ;;  %1377 = vmatprep.subr.bf16.mxu1 %v944_v0  ;;  %v1105_v23 = vpop.permute.xlu0 %1104 }
 0x257   :  { %1378 = vmatpush3.bf16.msra.mxu1 %v944_v0  ;;  %v1110_v62 = vpop.permute.xlu1 %1109 }
 0x258   :  { %v890_v9 = vadd.f32 %v1292_v7, %v708_v8  ;;  %v925_v10 = vmax.f32 %v887_v6, 0.0 }
 0x25a   :  { %v926_v11 = vmax.f32 %v890_v9, 0.0  ;;  %v1293_v12 = vpop.f32.mrb[20].mxu1  ;;  %v980_v2 = vpop.permute.xlu0 %979 }
 0x25b   :  { %v1294_v13 = vpop.f32.mrb[21].mxu1  ;;  %v1115_v30 = vpop.permute.xlu1 %1114 }
 0x25c   :  { %v1295_v14 = vadd.f32 %v1294_v13, %v1293_v12  ;;  %v1296_v15 = vpop.f32.mrb[22].mxu1  ;;  %v945_v16 = vpack.c.bf16 %v926_v11, %v925_v10 }
 0x25d   :  { %v1297_v20 = vpop.f32.mrb[23].mxu1 }
 0x25e   :  { %v895_v21 = vadd.f32 %v1295_v14, %v713_v17  ;;  %v1298_v22 = vadd.f32 %v1297_v20, %v1296_v15  ;;  %1379 = vmatprep.subr.bf16.mxu1 %v945_v16  ;;  %v985_v42 = vpop.permute.xlu0 %984 }
 0x25f   :  { %1380 = vmatpush3.bf16.msra.mxu1 %v945_v16  ;;  %v1120_v61 = vpop.permute.xlu1 %1119 }
 0x260   :  { %v898_v24 = vadd.f32 %v1298_v22, %v718_v32  ;;  %v927_v27 = vmax.f32 %v895_v21, 0.0 }
 0x262   :  { %v928_v33 = vmax.f32 %v898_v24, 0.0  ;;  %v1299_v29 = vpop.f32.mrb[24].mxu1  ;;  %v990_v10 = vpop.permute.xlu0 %989 }
 0x263   :  { %v1300_v25 = vpop.f32.mrb[25].mxu1  ;;  %v1125_v13 = vpop.permute.xlu1 %1124 }
 0x264   :  { %v1301_v26 = vadd.f32 %v1300_v25, %v1299_v29  ;;  %v1302_v28 = vpop.f32.mrb[26].mxu1  ;;  %v946_v31 = vpack.c.bf16 %v928_v33, %v927_v27 }
 0x265   :  { %v1303_v40 = vpop.f32.mrb[27].mxu1 }
 0x266   :  { %v903_v35 = vadd.f32 %v1301_v26, %v723_v34  ;;  %v1304_v36 = vadd.f32 %v1303_v40, %v1302_v28  ;;  %1381 = vmatprep.subr.bf16.mxu1 %v946_v31  ;;  %v995_v33 = vpop.permute.xlu0 %994 }
 0x267   :  { %1382 = vmatpush3.bf16.msra.mxu1 %v946_v31  ;;  %v1130_v40 = vpop.permute.xlu1 %1129 }
 0x268   :  { %v906_v41 = vadd.f32 %v1304_v36, %v728_v38  ;;  %v929_v39 = vmax.f32 %v903_v35, 0.0 }
 0x26a   :  { %v930_v4 = vmax.f32 %v906_v41, 0.0  ;;  %v1305_v37 = vpop.f32.mrb[28].mxu1 }
 0x26b   :  { %v1306_v43 = vpop.f32.mrb[29].mxu1 }
 0x26c   :  { %v1307_v50 = vadd.f32 %v1306_v43, %v1305_v37  ;;  %v1308_v52 = vpop.f32.mrb[30].mxu1  ;;  %v947_v1 = vpack.c.bf16 %v930_v4, %v929_v39  ;;  %v1135_v43 = vpop.permute.xlu0 %1134 }
 0x26d   :  { %v1309_v55 = vpop.f32.mrb[31].mxu1 }
 0x26e   :  { %v911_v48 = vadd.f32 %v1307_v50, %v733_v53  ;;  %v1310_v46 = vadd.f32 %v1309_v55, %v1308_v52  ;;  %1383 = vmatprep.subr.bf16.mxu1 %v947_v1 }
 0x26f   :  { %1384 = vmatpush3.bf16.msra.mxu1 %v947_v1  ;;  %v1140_v1 = vpop.permute.xlu1 %1139 }
 0x270   :  { %v914_v56 = vadd.f32 %v1310_v46, %v738_v44  ;;  %v931_v49 = vmax.f32 %v911_v48, 0.0  ;;  %v1169_v48 = vlaneseq }
 0x272   :  { %v932_v54 = vmax.f32 %v914_v56, 0.0  ;;  %v1170_v56 = vshrl.u32 %v1169_v48, 7 }
 0x274   :  { %v948_v19 = vpack.c.bf16 %v932_v54, %v931_v49 }
 0x276   :  { %1385 = vmatprep.subr.bf16.mxu1 %v948_v19 }
 0x277   :  { %1386 = vmatpush3.bf16.msra.mxu1 %v948_v19  ;;  %v1171_v19 = vsub.s32 0, %v1170_v56 }
 0x27a   :  { %1388 = vmatmul.mubr.bf16.vlgmr.msra.gmra.mrb[32].mxu1 %v1447_v45 }
 0x27b   :  { %1391 = vmatprep.mubr.bf16.mxu1 %v1448_v57  ;;  %v1167_v57 = vpop.permute.xlu0 %1166 }
 0x282   :  { %1392 = vmatmul.mubr.bf16.gmra.mrb[36].mxu1 %v1449_v58 }
 0x34d   :  { %v1389_v51 = vpop.f32.mrb[32].mxu1 }
 0x34e   :  { %v1055_v63 = vpop.f32.mrb[33].mxu1  ;;  %v1064_v0 = vadd.f32 %v1389_v51, %v970_v47 }
 0x34f   :  { %v1056_v3 = vadd.f32 %v1055_v63, %v960_v59  ;;  %v1390_v5 = vpop.f32.mrb[34].mxu1  ;;  %v1172_v59 = vrot.slane %v1167_v57, %v1171_v19 }
 0x350   :  { %v1067_v6 = vadd.f32 %v1390_v5, %v975_v60  ;;  %v1058_v7 = vpop.f32.mrb[35].mxu1  ;;  %v1088_v11 = vmax.f32 %v1064_v0, 0.0 }
 0x351   :  { %v1086_v8 = vmax.f32 %v1056_v3, 0.0  ;;  %v1059_v9 = vadd.f32 %v1058_v7, %v965_v18 }
 0x352   :  { %v1089_v14 = vmax.f32 %v1067_v6, 0.0  ;;  %v1144_v21 = vmul.f32 %v1115_v30, %v1088_v11 }
 0x353   :  { %v1087_v12 = vmax.f32 %v1059_v9, 0.0  ;;  %v1142_v15 = vmul.f32 %v1105_v23, %v1086_v8 }
 0x354   :  { %v1145_v29 = vmul.f32 %v1120_v61, %v1089_v14 }
 0x355   :  { %v1143_v16 = vmul.f32 %v1110_v62, %v1087_v12  ;;  %v1393_v17 = vpop.f32.mrb[36].mxu1 }
 0x356   :  { %v1071_v20 = vpop.f32.mrb[37].mxu1  ;;  %v1080_v32 = vadd.f32 %v1393_v17, %v990_v10 }
 0x357   :  { %v1150_v22 = vadd.f32 %v1143_v16, %v1142_v15  ;;  %v1072_v24 = vadd.f32 %v1071_v20, %v980_v2  ;;  %v1394_v27 = vpop.f32.mrb[38].mxu1 }
 0x358   :  { %v1074_v25 = vpop.f32.mrb[39].mxu1  ;;  %v1083_v31 = vadd.f32 %v1394_v27, %v995_v33  ;;  %v1092_v35 = vmax.f32 %v1080_v32, 0.0 }
 0x359   :  { %v1151_v26 = vadd.f32 %v1150_v22, %v1144_v21  ;;  %v1090_v28 = vmax.f32 %v1072_v24, 0.0  ;;  %v1075_v34 = vadd.f32 %v1074_v25, %v985_v42 }
 0x35a   :  { %v1093_v4 = vmax.f32 %v1083_v31, 0.0  ;;  %v1148_v50 = vmul.f32 %v1135_v43, %v1092_v35 }
 0x35b   :  { %v1146_v36 = vmul.f32 %v1125_v13, %v1090_v28  ;;  %v1152_v38 = vadd.f32 %v1151_v26, %v1145_v29  ;;  %v1091_v41 = vmax.f32 %v1075_v34, 0.0 }
 0x35c   :  { %v1149_v53 = vmul.f32 %v1140_v1, %v1093_v4 }
 0x35d   :  { %v1153_v39 = vadd.f32 %v1152_v38, %v1146_v36  ;;  %v1147_v37 = vmul.f32 %v1130_v40, %v1091_v41 }
 0x35f   :  { %v1154_v52 = vadd.f32 %v1153_v39, %v1147_v37 }
 0x361   :  { %v1155_v55 = vadd.f32 %v1154_v52, %v1148_v50 }
 0x363   :  { %v1156_v46 = vadd.f32 %v1155_v55, %v1149_v53 }
 0x365   :  { %v1157_v44 = vrot.slane %v1156_v46, 4 }
 0x367   :  { %v1158_v49 = vadd.f32 %v1157_v44, %v1156_v46 }
 0x369   :  { %v1159_v54 = vrot.slane %v1158_v49, 2 }
 0x36b   :  { %v1160_v45 = vadd.f32 %v1159_v54, %v1158_v49 }
 0x36d   :  { %v1161_v58 = vrot.slane %v1160_v45, 1 }
 0x36f   :  { %v1162_v18 = vadd.f32 %v1161_v58, %v1160_v45 }
 0x371   :  { %v1173_v47 = vadd.f32 %v1172_v59, %v1162_v18 }
 0x373   :  { %1174 = vst [vmem:[%s1912_s9] sm:$0x1] %v1173_v47 }

</bundles_post_ra>
